<compile_context>
chip_gen: v7x
topology: tpu7x:2x2x1
jax: 0.10.0
libtpu: 0.0.40
codegen_flags: <defaults>
</compile_context>

<pallas_src>
import functools
import math

import jax
import jax.numpy as jnp
from jax.experimental import pallas as pl
from jax.experimental.pallas import tpu as pltpu


# ----------------------------------------------------------------------------
# helpers
# ----------------------------------------------------------------------------
def _round_up(x, m):
    return (x + m - 1) // m * m


@functools.lru_cache(maxsize=1)
def _tpu_tuning():
    """(max_tile_bytes, vmem_limit_bytes, min_grid_steps) per TPU generation."""
    kind = ""
    try:
        kind = jax.devices()[0].device_kind.lower()
    except Exception:
        pass
    if "v6" in kind:                   # 128 MiB VMEM, 1 TC: big tiles, raise the 32 MiB scoped default
        return 4 << 20, 64 << 20, 1
    if "v5" in kind or "v4" in kind:   # 128 MiB VMEM, 1 TC; v5e scoped default is only 16 MiB
        return 3 << 20, 48 << 20, 1
    if "v2" in kind or "v3" in kind:   # small-VMEM legacy chips: stay conservative
        return 1 << 20, None, 1
    # v7x / unknown: 64 MiB physical VMEM, 2 TensorCores -> modest tiles, >= 2 parallel grid steps.
    return 2 << 20, None, 2


def _row_tile(n_rows, lane_width, max_tile_bytes, min_steps):
    """Largest multiple-of-8 row tile with one (tile, lane_width) f32 buffer <= max_tile_bytes,
    additionally capped so the 1-D 'parallel' grid has >= min_steps blocks (v7x megacore)."""
    fit = max(8, (max_tile_bytes // (lane_width * 4)) // 8 * 8)
    t = min(4096, fit, _round_up(max(n_rows, 1), 8))
    if min_steps > 1:
        t = min(t, max(8, _round_up(pl.cdiv(max(n_rows, 1), min_steps), 8)))
    return t


def _pack_factor(k_taps):
    """Input pixels packed per matmul output row so lane width r*k_taps is a multiple of 128
    (lane-dense, unmasked stores).  Falls back to 1 (full-dim block, still legal)."""
    if k_taps % 128 == 0:
        return 1
    r = 128 // math.gcd(k_taps, 128)          # = lcm(k_taps, 128) / k_taps
    return r if r <= 16 else 1


def _cparams(vmem_limit):
    return pltpu.CompilerParams(dimension_semantics=("parallel",),
                                vmem_limit_bytes=vmem_limit)


def _sublane_moments(v):
    """Per-sublane partial sum / sum-of-squares of a (rows, L) f32 tile -> two (8, L) arrays.
    Folding rows onto sublanes first keeps the reduction as plain VPU vreg adds (no XLU)."""
    vs = v.reshape(v.shape[0] // 8, 8, v.shape[1])
    return jnp.sum(vs, axis=0), jnp.sum(vs * vs, axis=0)


# ----------------------------------------------------------------------------
# Pallas kernel 1 (fast path, pass 1): tap matmul -> per-sublane moments only
# ----------------------------------------------------------------------------
def _tap_stats_kernel(x_ref, w_ref, ssum_ref, ssq_ref):
    # x_ref: (tr, r*Cin)   w_ref: (r*Cin, L)   L = r*kH*kW*Cout
    # The tap activations never touch HBM here -- they are recomputed in pass 2.
    p = jnp.dot(x_ref[...], w_ref[...], preferred_element_type=jnp.float32)
    cs, cq = _sublane_moments(p)
    ssum_ref[...] = cs[None]
    ssq_ref[...] = cq[None]


def _tap_stats(x_packed, w_bd, tr, vmem_limit):
    mr, rcin = x_packed.shape
    L = w_bd.shape[1]
    g = mr // tr
    return pl.pallas_call(
        _tap_stats_kernel,
        out_shape=(jax.ShapeDtypeStruct((g, 8, L), jnp.float32),
                   jax.ShapeDtypeStruct((g, 8, L), jnp.float32)),
        grid=(g,),
        in_specs=[
            pl.BlockSpec((tr, rcin), lambda i: (i, 0)),
            # Constant index_map -> the (tiny) weight stays resident in VMEM (no re-DMA).
            pl.BlockSpec((rcin, L), lambda i: (0, 0)),
        ],
        out_specs=(pl.BlockSpec((1, 8, L), lambda i: (i, 0, 0)),
                   pl.BlockSpec((1, 8, L), lambda i: (i, 0, 0))),
        compiler_params=_cparams(vmem_limit),
    )(x_packed, w_bd)


# ----------------------------------------------------------------------------
# Pallas kernel 2 (fast path, pass 2): fused tap matmul + BN apply + ReLU
# ----------------------------------------------------------------------------
def _tap_bn_relu_kernel(x_ref, w_ref, sc_ref, sh_ref, o_ref):
    p = jnp.dot(x_ref[...], w_ref[...], preferred_element_type=jnp.float32)
    o_ref[...] = jnp.maximum(p * sc_ref[...] + sh_ref[...], 0.0).astype(o_ref.dtype)


def _tap_bn_relu(x_packed, w_bd, scale_lane, shift_lane, tr, out_dtype, vmem_limit):
    mr, rcin = x_packed.shape
    L = w_bd.shape[1]
    g = mr // tr
    return pl.pallas_call(
        _tap_bn_relu_kernel,
        out_shape=jax.ShapeDtypeStruct((mr, L), out_dtype),
        grid=(g,),
        in_specs=[pl.BlockSpec((tr, rcin), lambda i: (i, 0)),
                  pl.BlockSpec((rcin, L), lambda i: (0, 0)),
                  pl.BlockSpec((1, L), lambda i: (0, 0)),
                  pl.BlockSpec((1, L), lambda i: (0, 0))],
        out_specs=pl.BlockSpec((tr, L), lambda i: (i, 0)),
        compiler_params=_cparams(vmem_limit),
    )(x_packed, w_bd, scale_lane, shift_lane)


# ----------------------------------------------------------------------------
# General-path kernels: plain tap matmul, tiled lane stats, tiled BN+ReLU apply
# ----------------------------------------------------------------------------
def _tap_matmul_kernel(x_ref, w_ref, p_ref):
    p_ref[...] = jnp.dot(x_ref[...], w_ref[...], preferred_element_type=jnp.float32)


def _tap_matmul(x_packed, w_bd, tr, vmem_limit):
    mr, rcin = x_packed.shape
    L = w_bd.shape[1]
    g = mr // tr
    return pl.pallas_call(
        _tap_matmul_kernel,
        out_shape=jax.ShapeDtypeStruct((mr, L), jnp.float32),
        grid=(g,),
        in_specs=[pl.BlockSpec((tr, rcin), lambda i: (i, 0)),
                  pl.BlockSpec((rcin, L), lambda i: (0, 0))],
        out_specs=pl.BlockSpec((tr, L), lambda i: (i, 0)),
        compiler_params=_cparams(vmem_limit),
    )(x_packed, w_bd)


def _lane_stats_kernel(y_ref, ssum_ref, ssq_ref):
    y = y_ref[...].astype(jnp.float32)
    cs, cq = _sublane_moments(y)
    ssum_ref[...] = cs[None]
    ssq_ref[...] = cq[None]


def _lane_stats(y2, tr, vmem_limit):
    rows, L = y2.shape
    g = rows // tr
    return pl.pallas_call(
        _lane_stats_kernel,
        out_shape=(jax.ShapeDtypeStruct((g, 8, L), jnp.float32),
                   jax.ShapeDtypeStruct((g, 8, L), jnp.float32)),
        grid=(g,),
        in_specs=[pl.BlockSpec((tr, L), lambda i: (i, 0))],
        out_specs=(pl.BlockSpec((1, 8, L), lambda i: (i, 0, 0)),
                   pl.BlockSpec((1, 8, L), lambda i: (i, 0, 0))),
        compiler_params=_cparams(vmem_limit),
    )(y2)


def _scale_shift_relu_kernel(y_ref, sc_ref, sh_ref, o_ref):
    y = y_ref[...].astype(jnp.float32)
    o_ref[...] = jnp.maximum(y * sc_ref[...] + sh_ref[...], 0.0).astype(o_ref.dtype)


def _scale_shift_relu(y2, scale_lane, shift_lane, tr, out_dtype, vmem_limit):
    rows, L = y2.shape
    g = rows // tr
    return pl.pallas_call(
        _scale_shift_relu_kernel,
        out_shape=jax.ShapeDtypeStruct((rows, L), out_dtype),
        grid=(g,),
        in_specs=[pl.BlockSpec((tr, L), lambda i: (i, 0)),
                  pl.BlockSpec((1, L), lambda i: (0, 0)),
                  pl.BlockSpec((1, L), lambda i: (0, 0))],
        out_specs=pl.BlockSpec((tr, L), lambda i: (i, 0)),
        compiler_params=_cparams(vmem_limit),
    )(y2, scale_lane, shift_lane)


def _fold_bn(lane_sum, lane_sq, group, cout, count, gamma, beta, eps):
    """Fold per-lane moments -> per-channel BN scale/shift (f32 accumulators throughout)."""
    ch_sum = lane_sum.reshape(group, cout).sum(axis=0)
    ch_sq = lane_sq.reshape(group, cout).sum(axis=0)
    mean = ch_sum / count
    var = jnp.maximum(ch_sq / count - mean * mean, 0.0)     # biased variance (BN training mode)
    inv = jax.lax.rsqrt(var + eps)
    scale_c = gamma.astype(jnp.float32) * inv
    shift_c = beta.astype(jnp.float32) - mean * scale_c
    return scale_c, shift_c


# ----------------------------------------------------------------------------
# Wrapper: deconv2DBatchNormRelu.forward
# ----------------------------------------------------------------------------
def deconv2d_batchnorm_relu(x_nchw, weight, bias, gamma, beta, *, stride, padding, eps=1e-5):
    """ConvTranspose2d(k, stride, padding, bias=True) + BatchNorm2d (batch stats) + ReLU.

    x_nchw : (N, Cin, Hin, Win)
    weight : (Cin, Cout, kH, kW)     PyTorch ConvTranspose2d weight layout
    bias, gamma, beta : (Cout,)
    """
    del bias  # per-channel constant cancels exactly in batch-statistics BatchNorm (see header).
    tile_bytes, vmem_limit, min_steps = _tpu_tuning()

    N, Cin, Hin, Win = x_nchw.shape
    _, Cout, kH, kW = weight.shape
    Hout = (Hin - 1) * stride - 2 * padding + kH
    Wout = (Win - 1) * stride - 2 * padding + kW

    dt = x_nchw.dtype                  # bf16 inputs flow straight into the MXU (f32 accumulate)
    # TODO(synk): on v6e/v7x an f32 caller could cast x/w to bf16 here to halve input-side DMA;
    #             skipped so f32 callers get bit-comparable results to the PyTorch module.
    K = kH * kW * Cout
    r = _pack_factor(K)                # pixels packed per matmul row -> lane width L
    L = r * K

    # --- pack input pixels + block-diagonal weight for a lane-dense matmul -------------------
    x_mat = jnp.transpose(x_nchw, (0, 2, 3, 1)).reshape(N * Hin * Win, Cin)
    M = N * Hin * Win
    M_r = pl.cdiv(M, r)
    tr = _row_tile(M_r, L, tile_bytes, min_steps)
    M_r_pad = _round_up(M_r, tr)
    M_pad = M_r_pad * r
    x_packed = jnp.pad(x_mat, ((0, M_pad - M), (0, 0))).reshape(M_r_pad, r * Cin)

    w_mat = jnp.transpose(weight, (0, 2, 3, 1)).reshape(Cin, K).astype(dt)
    w_bd = jnp.kron(jnp.eye(r, dtype=dt), w_mat)              # (r*Cin, L) block-diagonal

    fast = (stride == kH) and (stride == kW) and (padding == 0)
    if fast:
        # Pass 1: stats only.  Zero-padded rows contribute exactly zero to the moments, and for
        # the non-overlapping stride==k case taps <-> output pixels is a bijection, so these ARE
        # the BatchNorm batch statistics.  The tap activations are recomputed in pass 2 instead
        # of being written to / re-read from HBM.
        ssum, ssq = _tap_stats(x_packed, w_bd, tr, vmem_limit)
        lane_sum = jnp.sum(ssum, axis=(0, 1))
        lane_sq = jnp.sum(ssq, axis=(0, 1))
        count = jnp.float32(M * kH * kW)                      # == N*Hout*Wout
        scale_c, shift_c = _fold_bn(lane_sum, lane_sq, r * kH * kW, Cout, count,
                                    gamma, beta, eps)
        scale_lane = jnp.tile(scale_c, r * kH * kW).reshape(1, L)
        shift_lane = jnp.tile(shift_c, r * kH * kW).reshape(1, L)

        # Pass 2: fused matmul + BN apply + ReLU, emitted lane-dense in the input dtype.
        o4 = _tap_bn_relu(x_packed, w_bd, scale_lane, shift_lane, tr, dt, vmem_limit)

        # depth-to-space + NHWC->NCHW in a single XLA transpose (pure layout plumbing, in dt).
        # TODO(synk): returning NHWC (when the consumer allows) would remove this last full pass.
        o6 = o4.reshape(M_pad, K)[:M].reshape(N, Hin, Win, kH, kW, Cout)
        return jnp.transpose(o6, (0, 5, 1, 3, 2, 4)).reshape(N, Cout, Hout, Wout)

    # --- general path: overlapping taps (stride < k) and/or padding crop ----------------------
    p4 = _tap_matmul(x_packed, w_bd, tr, vmem_limit)
    p6 = p4.reshape(M_pad, K)[:M].reshape(N, Hin, Win, kH, kW, Cout)
    full_h = (Hin - 1) * stride + kH
    full_w = (Win - 1) * stride + kW
    out_full = jnp.zeros((N, full_h, full_w, Cout), jnp.float32)
    hi = jnp.arange(Hin) * stride
    wi = jnp.arange(Win) * stride
    # TODO(synk): replace this XLA scatter-add with a tiled Pallas overlap-add (+fused stats) to
    #             cut the ~2*kH*kW read-modify-write HBM passes; kept as-is (rare fallback path).
    for kh in range(kH):
        for kw in range(kW):
            out_full = out_full.at[:, hi[:, None] + kh, wi[None, :] + kw, :].add(
                p6[:, :, :, kh, kw, :])
    out_nhwc = out_full[:, padding:padding + Hout, padding:padding + Wout, :]

    # lane-dense 2-D view: rows = N*Hout, lanes = Wout*Cout
    R = N * Hout
    L2 = Wout * Cout
    y2 = out_nhwc.reshape(R, L2)
    tr2 = _row_tile(R, L2, tile_bytes, min_steps)
    R_pad = _round_up(R, tr2)
    y2 = jnp.pad(y2, ((0, R_pad - R), (0, 0)))

    ssum2, ssq2 = _lane_stats(y2, tr2, vmem_limit)
    lane_sum = jnp.sum(ssum2, axis=(0, 1))
    lane_sq = jnp.sum(ssq2, axis=(0, 1))
    count = jnp.float32(N * Hout * Wout)
    scale_c, shift_c = _fold_bn(lane_sum, lane_sq, Wout, Cout, count, gamma, beta, eps)
    scale_lane = jnp.tile(scale_c, Wout).reshape(1, L2)
    shift_lane = jnp.tile(shift_c, Wout).reshape(1, L2)

    o2 = _scale_shift_relu(y2, scale_lane, shift_lane, tr2, dt, vmem_limit)[:R]
    return jnp.transpose(o2.reshape(N, Hout, Wout, Cout), (0, 3, 1, 2))


# ----------------------------------------------------------------------------
# Pure-JAX reference (includes the conv-transpose bias; it cancels in BN)
# ----------------------------------------------------------------------------
def _reference(x, weight, bias, gamma, beta, stride, padding, eps=1e-5):
    Cin, Cout, kH, kW = weight.shape
    w_conv = jnp.flip(jnp.transpose(weight, (1, 0, 2, 3)), axis=(2, 3))
    y = jax.lax.conv_general_dilated(
        x, w_conv, window_strides=(1, 1),
        padding=[(kH - 1 - padding, kH - 1 - padding),
                 (kW - 1 - padding, kW - 1 - padding)],
        lhs_dilation=(stride, stride),
        dimension_numbers=("NCHW", "OIHW", "NCHW"))
    y = y + bias[None, :, None, None]
    mean = jnp.mean(y, axis=(0, 2, 3), keepdims=True)
    var = jnp.mean((y - mean) ** 2, axis=(0, 2, 3), keepdims=True)
    yn = (y - mean) * jax.lax.rsqrt(var + eps)
    return jnp.maximum(yn * gamma[None, :, None, None] + beta[None, :, None, None], 0.0)


if __name__ == "__main__":
    def _make(key, N, Cin, Cout, k, Hin, Win):
        k_x, k_w, k_b, k_g, k_be = jax.random.split(key, 5)
        x = jax.random.normal(k_x, (N, Cin, Hin, Win), jnp.float32)
        w = 0.1 * jax.random.normal(k_w, (Cin, Cout, k, k), jnp.float32)
        b = 0.1 * jax.random.normal(k_b, (Cout,), jnp.float32)
        g = 1.0 + 0.1 * jax.random.normal(k_g, (Cout,), jnp.float32)
        be = 0.1 * jax.random.normal(k_be, (Cout,), jnp.float32)
        return x, w, b, g, be

    key = jax.random.PRNGKey(0)
    k1, k2 = jax.random.split(key)

    # Config 1 — the module spec: deconv2DBatchNormRelu(4, 8, k_size=2, stride=2, padding=0)
    x, w, b, g, be = _make(k1, 2, 4, 8, 2, 16, 16)
    out = jax.block_until_ready(
        deconv2d_batchnorm_relu(x, w, b, g, be, stride=2, padding=0))
    assert out.shape == (2, 8, 32, 32), out.shape
    ref = _reference(x, w, b, g, be, 2, 0)
    err = float(jnp.max(jnp.abs(out - ref)))
    assert jnp.allclose(out, ref, atol=1e-3, rtol=1e-3), err

    # Config 2 — general path (overlapping taps + padding crop): k=3, stride=2, padding=1
    x2, w2, b2, g2, be2 = _make(k2, 1, 4, 8, 3, 8, 8)
    out2 = jax.block_until_ready(
        deconv2d_batchnorm_relu(x2, w2, b2, g2, be2, stride=2, padding=1))
    assert out2.shape == (1, 8, 15, 15), out2.shape
    ref2 = _reference(x2, w2, b2, g2, be2, 2, 1)
    err2 = float(jnp.max(jnp.abs(out2 - ref2)))
    assert jnp.allclose(out2, ref2, atol=1e-3, rtol=1e-3), err2

    print("KERNEL_OK")
</pallas_src>

<mosaic_0001>
module attributes {stable_mosaic.version = 11 : i64} {
  func.func @_tap_stats_kernel(%arg0: i32, %arg1: memref<64x16xf32, #tpu.memory_space<vmem>>, %arg2: memref<16x128xf32, #tpu.memory_space<vmem>>, %arg3: memref<1x8x128xf32, #tpu.memory_space<vmem>>, %arg4: memref<1x8x128xf32, #tpu.memory_space<vmem>>) attributes {dimension_semantics = [#tpu.dimension_semantics<parallel>], iteration_bounds = array<i64: 2>, scalar_prefetch = 0 : i64, scratch_operands = 0 : i64, tpu.core_type = #tpu.core_type<tc>, window_params = [{transform_indices = @transform_0, window_bounds = array<i64: 64, 16>}, {pipeline_mode = #tpu.pipeline_mode<synchronous>, transform_indices = @transform_1, window_bounds = array<i64: 16, 128>}, {transform_indices = @transform_2, window_bounds = array<i64: 1, 8, 128>}, {transform_indices = @transform_3, window_bounds = array<i64: 1, 8, 128>}]} {
    %c0 = arith.constant 0 : index
    %c0_0 = arith.constant 0 : index
    %0 = vector.load %arg1[%c0, %c0_0] : memref<64x16xf32, #tpu.memory_space<vmem>>, vector<64x16xf32>
    %c0_1 = arith.constant 0 : index
    %c0_2 = arith.constant 0 : index
    %1 = vector.load %arg2[%c0_1, %c0_2] : memref<16x128xf32, #tpu.memory_space<vmem>>, vector<16x128xf32>
    %cst = arith.constant dense<0.000000e+00> : vector<64x128xf32>
    %2 = tpu.matmul %0, %1, %cst {dimension_numbers = #tpu.dot_dimension_numbers<[1], [0], [0], [1], [0, 0, 1, 1], [], []>} : vector<64x16xf32>, vector<16x128xf32>, vector<64x128xf32> -> vector<64x128xf32>
    %3 = vector.shape_cast %2 : vector<64x128xf32> to vector<8x8x128xf32>
    %cst_3 = arith.constant dense<0.000000e+00> : vector<8x128xf32>
    %4 = vector.multi_reduction <add>, %3, %cst_3 [0] : vector<8x8x128xf32> to vector<8x128xf32>
    %5 = arith.mulf %3, %3 : vector<8x8x128xf32>
    %cst_4 = arith.constant dense<0.000000e+00> : vector<8x128xf32>
    %6 = vector.multi_reduction <add>, %5, %cst_4 [0] : vector<8x8x128xf32> to vector<8x128xf32>
    %7 = vector.shape_cast %4 : vector<8x128xf32> to vector<1x8x128xf32>
    %c0_5 = arith.constant 0 : index
    %c0_6 = arith.constant 0 : index
    %c0_7 = arith.constant 0 : index
    %8 = vector.load %arg3[%c0_5, %c0_6, %c0_7] : memref<1x8x128xf32, #tpu.memory_space<vmem>>, vector<1x8x128xf32>
    tpu.vector_store %arg3[%c0_5, %c0_6, %c0_7], %7 {strides = array<i32>} : memref<1x8x128xf32, #tpu.memory_space<vmem>>, vector<1x8x128xf32>,
    %9 = vector.shape_cast %6 : vector<8x128xf32> to vector<1x8x128xf32>
    %c0_8 = arith.constant 0 : index
    %c0_9 = arith.constant 0 : index
    %c0_10 = arith.constant 0 : index
    %10 = vector.load %arg4[%c0_8, %c0_9, %c0_10] : memref<1x8x128xf32, #tpu.memory_space<vmem>>, vector<1x8x128xf32>
    tpu.vector_store %arg4[%c0_8, %c0_9, %c0_10], %9 {strides = array<i32>} : memref<1x8x128xf32, #tpu.memory_space<vmem>>, vector<1x8x128xf32>,
    return
  }
  func.func @transform_0(%arg0: i32) -> (i32, i32) {
    %c0_i32 = arith.constant 0 : i32
    %c0_i32_0 = arith.constant 0 : i32
    return %arg0, %c0_i32 : i32, i32
  }
  func.func @transform_1(%arg0: i32) -> (i32, i32) {
    %c0_i32 = arith.constant 0 : i32
    %c0_i32_0 = arith.constant 0 : i32
    %c0_i32_1 = arith.constant 0 : i32
    return %c0_i32, %c0_i32_0 : i32, i32
  }
  func.func @transform_2(%arg0: i32) -> (i32, i32, i32) {
    %c0_i32 = arith.constant 0 : i32
    %c0_i32_0 = arith.constant 0 : i32
    %c0_i32_1 = arith.constant 0 : i32
    return %arg0, %c0_i32, %c0_i32_0 : i32, i32, i32
  }
  func.func @transform_3(%arg0: i32) -> (i32, i32, i32) {
    %c0_i32 = arith.constant 0 : i32
    %c0_i32_0 = arith.constant 0 : i32
    %c0_i32_1 = arith.constant 0 : i32
    return %arg0, %c0_i32, %c0_i32_0 : i32, i32, i32
  }
}

</mosaic_0001>

<bundles_post_ra>
// kernel: tpu_custom_call.1
= control target key start
LH: loop header
LB: loop body
LE: loop exit
PB: predicated region body
PF: predicated region fallthrough
CT: control target
= control target key end

     0   :  { %9 = vsyncpa [#allocation3], 0  ;;  %s835_s0 = inlined_call_operand.vmem [shape: f32[128,16], index: 0, kind: input, shape index: {}]   ;;  %s836_s1 = inlined_call_operand.vmem [shape: f32[16,128], index: 1, kind: input, shape index: {}]   ;;  %s837_s2 = inlined_call_operand.hbm [shape: f32[2,8,128], index: 2, kind: output, shape index: {0}]   ;;  %s838_s3 = inlined_call_operand.hbm [shape: f32[2,8,128], index: 3, kind: output, shape index: {1}]  }
   0x1   :  { %11 = vsyncpa [#allocation3 + $0x1], 0 }
   0x2   :  { %12 = vsyncpa [#allocation5], 0 }
   0x3   :  { %14 = vsyncpa [#allocation5 + $0x1], 0  ;;  %s685_s12 = smov 0   ;;  %s687_s13 = smov 0  }
   0x4   :  { %s689_s14 = smov 0   ;;  %s691_s15 = smov 0  }
   0x5 LB: > { %s706_s16 = sadd.s32 4294967295, %s661_s15   ;;  %s469_s17 = sadd.s32 4294967294, %s661_s15   ;;  %s661_s15 = sphi %s691_s15, %s844_s15   ;;  %s657_s14 = sphi %s689_s14, %s843_s14   ;;  %s653_s13 = sphi %s687_s13, %s842_s13   ;;  %s649_s12 = sphi %s685_s12, %s841_s12  }
   0x6   : > { %s710_s18 = sadd.s32 1, %s661_s15   ;;  %s74_s19 = sadd.s32 1, %s657_s14 }
   0x7   : > { %s71_s20 = ssub.s32 %s661_s15, %s710_s18  ;;  %p84_p0 = scmp.ne.s32.totalorder %s657_s14, %s653_s13 }
   0x8   : > { %p72_p1 = scmp.eq.s32.totalorder %s71_s20, 0  ;;  %p85_p2 = scmp.eq.s32.totalorder %s706_s16, 1 }
   0x9   : > { %p90_p3 = scmp.ne.s32.totalorder %s653_s13, %s649_s12  ;;  %p91_p4 = scmp.eq.s32.totalorder %s469_s17, 1 }
   0xa   : > { %s721_s21 = scalar_select %p72_p1, %s657_s14, %s74_s19  }
   0xb   : > { %p723_p5 = por %p85_p2, %p84_p0  ;;  %p727_p6 = por %p91_p4, %p90_p3 }
   0xc   : > { %p472_p7 = scmp.ge.s32.totalorder %s661_s15, 1  ;;  %p147_p8 = scmp.lt.s32.totalorder %s661_s15, 3 }
   0xe   : > { %p148_p9 = pnand %p472_p7, %p147_p8 }
   0xf   : > { %v190_v0 = vld [vmem:[%s836_s1] sm:$0xff] (!%p148_p9)  ;;  %v191_v1 = vld [vmem:[%s836_s1 + $0x8] sm:$0xff] (!%p148_p9)  ;;  %s475_s28 = sshll.u32 (!%p148_p9), %s706_s16, 3  ;;  %vm192_vm0 = vcmask (!%p148_p9), 130048   ;;  %s752_s6 = sand.u32 (!%p148_p9), 1, %s653_s13  }
  0x10   : > { %151 = sbr.rel (%p148_p9) target bundleno = 294 (0x126), region = 28  ;;  %v517_v2 = vpack.c.bf16 (!%p148_p9), %v191_v1, %v190_v0  ;;  %p177_p10 = scmp.lt.s32.totalorder (!%p148_p9), %s475_s28, 15 }
  0x11   : > { %s473_s7 = sshll.u32 (!%p148_p9), %s752_s6, 3  ;;  %s487_s8 = sshll.u32 (!%p148_p9), %s706_s16, 7 }
  0x12   : > { %518 = vmatprep.subr.bf16.mxu0 (!%p148_p9), %v517_v2  ;;  %521 = vmatprep.subr.bf16.mxu1 (!%p148_p9), %v517_v2  ;;  %s168_s9 = scalar_lea.vmem (!%p148_p9), [#allocation2], %s473_s7  ;;  %s756_s11 = scalar_lea.vmem (!%p148_p9), [#allocation4], %s473_s7 }
  0x13   : > { %520 = vmatpush3.bf16.msra.mxu0 (!%p148_p9), %v517_v2  ;;  %522 = vmatpush3.bf16.msra.mxu1 (!%p148_p9), %v517_v2  ;;  %s365_s10 = sshll.u32 (!%p148_p9), %s168_s9, 4  ;;  %s378_s17 = sshll.u32 (!%p148_p9), %s756_s11, 4  ;;  %s764_s10 = int_to_ptr.vmem [resolvable:$true] %s365_s10  ;;  %s771_s17 = int_to_ptr.vmem [resolvable:$true] %s378_s17 }
  0x14   : > { %s762_s24 = scalar_lea.hbm (!%p148_p9), %s837_s2, %s487_s8  ;;  %s769_s26 = scalar_lea.hbm (!%p148_p9), %s838_s3, %s487_s8 }
  0x15   : > { %s347_s27 = scalar_lea.sflag (!%p148_p9), [#allocation3], %s752_s6 }
  0x17   : > { %s846_s28 = smov (!%p177_p10, %s475_s28), 15 }
  0x18   : > { %s476_s29 = sshll.u32 %s846_s28, 3  ;;  %s567_s28 = scalar_lea.vmem %s764_s10, 128 }
  0x19   : > { %s180_s5 = scalar_lea.vmem %s835_s0, %s476_s29  ;;  %p568_p11 = scmp.ne.s32.totalorder %s764_s10, %s567_s28 }
  0x1a   : > { %v182_v3 = vld [vmem:[%s180_s5] sm:$0xff]  ;;  %v183_v4 = vld [vmem:[%s180_s5 + $0x8] sm:$0xff]  ;;  %v184_v5 = vld [vmem:[%s180_s5 + $0x10] sm:$0xff]  ;;  %s663_s29 = smov [#allocation2]  }
  0x1b   : > { %505 = vmatprep.mubr.msk.f32.mxu0 %vm192_vm0, %v182_v3  ;;  %v186_v6 = vld [vmem:[%s180_s5 + $0x20] sm:$0xff]  ;;  %v187_v7 = vld [vmem:[%s180_s5 + $0x28] sm:$0xff]  ;;  %v188_v8 = vld [vmem:[%s180_s5 + $0x30] sm:$0xff]  ;;  %p569_p12 = pnand %p568_p11, %p723_p5  ;;  %s571_s30 = sshll.u32 %s663_s29, 4  ;;  %s572_s30 = int_to_ptr.vmem [resolvable:$false] %s571_s30 }
  0x1c   : > { %506 = vmatmul.mubr.msk.f32.vlgmr.msra.gmra.mrb[0].mxu0 %vm192_vm0, %v183_v4  ;;  %511 = vmatprep.mubr.msk.f32.mxu1 %vm192_vm0, %v186_v6  ;;  %v185_v9 = vld [vmem:[%s180_s5 + $0x18] sm:$0xff]  ;;  %s573_s4 = scalar_lea.vmem %s572_s30, 256  ;;  %p574_p0 = scmp.lt.s32.totalorder %s764_s10, %s572_s30 }
  0x1d   : > { %508 = vmatprep.mubr.msk.f32.mxu0 %vm192_vm0, %v184_v5  ;;  %512 = vmatmul.mubr.msk.f32.vlgmr.msra.gmra.mrb[0].mxu1 %vm192_vm0, %v187_v7  ;;  %v189_v10 = vld [vmem:[%s180_s5 + $0x38] sm:$0xff]  ;;  %p570_p13 = pneg %p569_p12  ;;  %p575_p1 = scmp.lt.s32.totalorder %s573_s4, %s567_s28 }
  0x1e   : > { %514 = vmatprep.mubr.msk.f32.mxu1 %vm192_vm0, %v188_v8 }
  0x1f   : > { %p576_p2 = por %p575_p1, %p574_p0 }
  0x20   : > { %509 = vmatmul.mubr.msk.f32.gmra.mrb[2].mxu0 %vm192_vm0, %v185_v9 }
  0x21   : > { %515 = vmatmul.mubr.msk.f32.gmra.mrb[2].mxu1 %vm192_vm0, %v189_v10  ;;  %p577_p3 = pnand %p576_p2, %p570_p13 }
  0xef   : > { %v507_v11 = vpop.f32.mrb[0].mxu0 }
  0xf0   : > { %v330_v12 = vmul.f32 %v507_v11, %v507_v11  ;;  %v283_v13 = vpop.f32.mrb[1].mxu0  ;;  %v513_v14 = vpop.f32.mrb[0].mxu1 }
  0xf1   : > { %v322_v15 = vadd.f32 %v507_v11, %v283_v13  ;;  %v329_v16 = vmul.f32 %v283_v13, %v283_v13  ;;  %v303_v17 = vpop.f32.mrb[1].mxu1  ;;  %v334_v31 = vmul.f32 %v513_v14, %v513_v14 }
  0xf2   : > { %v333_v28 = vmul.f32 %v303_v17, %v303_v17 }
  0xf3   : > { %v337_v18 = vadd.f32 %v330_v12, %v329_v16  ;;  %v510_v19 = vpop.f32.mrb[2].mxu0 }
  0xf4   : > { %v293_v20 = vpop.f32.mrb[3].mxu0  ;;  %v516_v21 = vpop.f32.mrb[2].mxu1  ;;  %v332_v25 = vmul.f32 %v510_v19, %v510_v19 }
  0xf5   : > { %v323_v22 = vadd.f32 %v322_v15, %v293_v20  ;;  %v331_v23 = vmul.f32 %v293_v20, %v293_v20  ;;  %v313_v24 = vpop.f32.mrb[3].mxu1  ;;  %v336_v37 = vmul.f32 %v516_v21, %v516_v21 }
  0xf6   : > { %v335_v34 = vmul.f32 %v313_v24, %v313_v24 }
  0xf7   : > { %v324_v26 = vadd.f32 %v510_v19, %v323_v22  ;;  %v338_v27 = vadd.f32 %v337_v18, %v331_v23 }
  0xf9   : > { %v339_v29 = vadd.f32 %v338_v27, %v332_v25  ;;  %v325_v30 = vadd.f32 %v324_v26, %v303_v17 }
  0xfb   : > { %v340_v32 = vadd.f32 %v339_v29, %v333_v28  ;;  %v326_v33 = vadd.f32 %v513_v14, %v325_v30 }
  0xfd   : > { %v327_v35 = vadd.f32 %v326_v33, %v313_v24  ;;  %v341_v36 = vadd.f32 %v340_v32, %v334_v31 }
  0xff   : > { %v328_v38 = vadd.f32 %v516_v21, %v327_v35  ;;  %v342_v39 = vadd.f32 %v341_v36, %v335_v34 }
 0x101   : > { %v343_v40 = vadd.f32 %v342_v39, %v336_v37  ;;  %344 = vst [vmem:[%s168_s9] sm:$0xff] %v328_v38 }
 0x102   : > { %580 = shalt.err (!%p577_p3)
}
 0x103   : > { %s581_s5 = scalar_lea.hbm %s762_s24, 128  ;;  %s585_s9 = scalar_lea.hbm %s837_s2, 256 }
 0x104   : > { %p582_p4 = scmp.ne.s32.totalorder %s762_s24, %s581_s5  ;;  %p586_p9 = scmp.lt.u32.totalorder %s762_s24, %s837_s2 }
 0x105   : > { %p587_p10 = scmp.lt.u32.totalorder %s585_s9, %s581_s5  ;;  %p589_p12 = scmp.lt.u32.totalorder %s581_s5, %s762_s24 }
 0x106   : > { %p583_p7 = pnand %p582_p4, %p723_p5 }
 0x107   : > { %p588_p11 = por %p587_p10, %p586_p9 }
 0x108   : > { %p584_p8 = pneg %p583_p7 }
 0x109   : > { %p590_p13 = por %p589_p12, %p588_p11 }
 0x10b   : > { %p591_p0 = pnand %p590_p13, %p584_p8 }
 0x10d   : > { %594 = shalt.err (!%p591_p0)
}
 0x10e   : > { %523 = dma.vmem_to_hbm [thread:$0]  (%p723_p5), %s764_s10, 128, %s762_s24, %s347_s27   ;;  %345 = vst [vmem:[%s756_s11] sm:$0xff] %v343_v40 }
 0x10f   : > { %s352_s16 = scalar_lea.sflag [#allocation5], %s752_s6  ;;  %s595_s25 = scalar_lea.vmem %s771_s17, 128 }
 0x110   : > { %p596_p1 = scmp.ne.s32.totalorder %s771_s17, %s595_s25  ;;  %s664_s28 = smov [#allocation4]  }
 0x111   : > { %s599_s29 = sshll.u32 %s664_s28, 4  ;;  %s600_s29 = int_to_ptr.vmem [resolvable:$false] %s599_s29 }
 0x112   : > { %p597_p2 = pnand %p596_p1, %p723_p5  ;;  %s601_s30 = scalar_lea.vmem %s600_s29, 256 }
 0x113   : > { %p602_p4 = scmp.lt.s32.totalorder %s771_s17, %s600_s29  ;;  %p603_p7 = scmp.lt.s32.totalorder %s601_s30, %s595_s25 }
 0x114   : > { %p598_p3 = pneg %p597_p2 }
 0x115   : > { %p604_p8 = por %p603_p7, %p602_p4 }
 0x117   : > { %p605_p9 = pnand %p604_p8, %p598_p3 }
 0x119   : > { %608 = shalt.err (!%p605_p9)
}
 0x11a   : > { %s609_s6 = scalar_lea.hbm %s769_s26, 128  ;;  %s613_s24 = scalar_lea.hbm %s838_s3, 256 }
 0x11b   : > { %p610_p10 = scmp.ne.s32.totalorder %s769_s26, %s609_s6  ;;  %p614_p13 = scmp.lt.u32.totalorder %s769_s26, %s838_s3 }
 0x11c   : > { %p615_p0 = scmp.lt.u32.totalorder %s613_s24, %s609_s6  ;;  %p617_p2 = scmp.lt.u32.totalorder %s609_s6, %s769_s26 }
 0x11d   : > { %p611_p11 = pnand %p610_p10, %p723_p5 }
 0x11e   : > { %p616_p1 = por %p615_p0, %p614_p13 }
 0x11f   : > { %p612_p12 = pneg %p611_p11 }
 0x120   : > { %p618_p3 = por %p617_p2, %p616_p1 }
 0x122   : > { %p619_p4 = pnand %p618_p3, %p612_p12 }
 0x124   : > { %622 = shalt.err (!%p619_p4)
}
 0x125   : > { %524 = dma.vmem_to_hbm [thread:$0]  (%p723_p5), %s771_s17, 128, %s769_s26, %s352_s16  }
 0x126 PF: > { %p534_p7 = scmp.ge.s32.totalorder %s661_s15, 2  ;;  %s390_s5 = sand.u32 1, %s649_s12  }
 0x127   : > { %s391_s7 = scalar_lea.sflag [#allocation3], %s390_s5 }
 0x128   : > { %p528_p8 = pnand %p534_p7, %p727_p6 }
 0x12a   : > { %640 = dma.done.wait (!%p528_p8), %s391_s7, 128  }
 0x12b   : > { %642 = vsyncadd (!%p528_p8), %s391_s7, 4294967168  ;;  %s400_s8 = scalar_lea.sflag [#allocation5], %s390_s5 }
 0x12c   : > { %644 = dma.done.wait (!%p528_p8), %s400_s8, 128  }
 0x12d   : > { %646 = vsyncadd (!%p528_p8), %s400_s8, 4294967168  ;;  %p17_p5 = scmp.ge.s32.totalorder %s710_s18, 4   ;;  %s841_s12 = smov %s653_s13 }
 0x12e   : > { %s842_s13 = smov %s657_s14  ;;  %s843_s14 = smov %s721_s21 }
 0x12f   : > { %s844_s15 = smov %s710_s18  ;;  %19 = sbr.rel (!%p17_p5) target bundleno = 5 (0x5), region = 80 }
 0x136   :  { %405 = vsyncpa [#allocation3], 1 }
 0x137   :  { %407 = vsyncpa [#allocation3 + $0x1], 1 }
 0x138   :  { %408 = vsyncpa [#allocation5], 1 }
 0x139   :  { %410 = vsyncpa [#allocation5 + $0x1], 1 }

</bundles_post_ra>
